<compile_context>
chip_gen: v5e
topology: v5e:2x2
jax: 0.10.0
libtpu: 0.0.40
codegen_flags: <defaults>
</compile_context>

<pallas_src>
import jax
import jax.numpy as jnp
from jax import lax
from jax.experimental import pallas as pl
from jax.experimental.pallas import tpu as pltpu

# Contract x (n, D) with memory (m, D) over D without materializing a transpose.
_DN = (((1,), (1,)), ((), ()))

_SMALL_PROBLEM_BYTES = 2 * 1024 * 1024     # below this, skip the grid entirely
_TN_CAND = (2048, 1024, 512, 256, 128, 64, 32, 16, 8)
_TM_CAND = (4096, 2048, 1024, 512, 256, 128)

_TPU_PARAMS_CACHE = None


def _tpu_params():
    """(vmem_capacity_bytes, num_tensorcores) with safe fallbacks."""
    global _TPU_PARAMS_CACHE
    if _TPU_PARAMS_CACHE is not None:
        return _TPU_PARAMS_CACHE
    vmem = 64 * 1024 * 1024          # conservative default: v7x per-TC VMEM
    cores = None
    try:
        info = pltpu.get_tpu_info()
        for name in ("vmem_capacity_bytes", "vmem_bytes", "vmem_size_bytes"):
            v = getattr(info, name, None)
            if v:
                vmem = int(v)
                break
        for name in ("num_tensorcores", "tensorcores_per_chip", "num_cores",
                     "cores_per_chip"):
            c = getattr(info, name, None)
            if c:
                cores = int(c)
                break
    except Exception:
        pass
    if cores is None:
        # v7x exposes 64 MiB per TensorCore and has 2 TCs/chip; v5e/v6e have
        # 128 MiB and a single TC.
        cores = 2 if vmem <= 80 * 1024 * 1024 else 1
    _TPU_PARAMS_CACHE = (vmem, cores)
    return _TPU_PARAMS_CACHE


# ----------------------------------------------------------------------------
# Single-invocation kernels (whole problem resident in VMEM, grid=()).
# ----------------------------------------------------------------------------
def _small_all_kernel(x_ref, mem_ref, out_ref):
    sims = lax.dot_general(x_ref[...], mem_ref[...], _DN,
                           preferred_element_type=jnp.float32)
    out_ref[...] = sims.astype(out_ref.dtype)


def _small_max_kernel(x_ref, mem_ref, max_ref):
    sims = lax.dot_general(x_ref[...], mem_ref[...], _DN,
                           preferred_element_type=jnp.float32)
    max_ref[...] = sims.max(axis=1, keepdims=True).astype(max_ref.dtype)


# ----------------------------------------------------------------------------
# Tiled kernels (large N / M).
# ----------------------------------------------------------------------------
def _tiled_all_kernel(x_ref, mem_ref, out_ref):
    sims = lax.dot_general(x_ref[...], mem_ref[...], _DN,
                           preferred_element_type=jnp.float32)
    out_ref[...] = sims.astype(out_ref.dtype)


def _tiled_max_kernel(x_ref, mem_ref, out_ref, acc_ref):
    # j (pool axis) is the reduction axis: it must stay "arbitrary" because the
    # lane-dense (1, tn) running max is carried in VMEM scratch across j.
    j = pl.program_id(1)

    @pl.when(j == 0)
    def _():
        acc_ref[...] = jnp.full(acc_ref.shape, -jnp.inf, acc_ref.dtype)

    # sims laid out (tm, tn): batch rows on the 128-lane axis, so the reduce and
    # the accumulator are lane-dense and the final store is unmasked.
    sims = lax.dot_general(mem_ref[...], x_ref[...], _DN,
                           preferred_element_type=jnp.float32)
    acc_ref[...] = jnp.maximum(acc_ref[...], sims.max(axis=0, keepdims=True))

    @pl.when(j == pl.num_programs(1) - 1)
    def _():
        out_ref[...] = acc_ref[...].astype(out_ref.dtype)


# ----------------------------------------------------------------------------
# Tile selection.
# ----------------------------------------------------------------------------
def _divisors_desc(n, candidates):
    return [c for c in candidates if c < n and n % c == 0]


def _vmem_estimate(tn, tm, d, in_bytes, out_bytes, full_out):
    x_tiles = 2 * tn * d * in_bytes            # double-buffered x tile
    m_tiles = 3 * tm * d * in_bytes            # up-to-triple-buffered pool tile
    sims = tn * tm * 4                         # f32 matmul intermediate
    if full_out:
        out_tiles = 2 * tn * tm * out_bytes    # double-buffered (tn, tm) output
    else:
        out_tiles = 3 * tn * 4                 # (1, tn) output + f32 scratch
    return x_tiles + m_tiles + sims + out_tiles


def _pick_tiles(n, m, d, in_bytes, out_bytes, full_out, budget, dual_tc,
                max_tn=None, max_tm=None):
    if full_out:
        tn_opts = [n] + _divisors_desc(n, _TN_CAND)
    else:
        # Lane-dense (1, tn) output block: tn must be a multiple of 128 or == n.
        tn_opts = [n] + [c for c in _divisors_desc(n, _TN_CAND) if c % 128 == 0]
    tm_opts = [m] + _divisors_desc(m, _TM_CAND)

    if max_tn is not None:
        tn_opts = [t for t in tn_opts if t <= max_tn] or [min(tn_opts)]
    if max_tm is not None:
        tm_opts = [t for t in tm_opts if t <= max_tm] or [min(tm_opts)]

    fallback = (min(tn_opts), min(tm_opts))

    if dual_tc:
        # Prefer >= 2 programs on the parallel (i) axis only when a second
        # TensorCore exists to use them.
        pref = [t for t in tn_opts if n // t >= 2]
        tn_opts = pref + [t for t in tn_opts if t not in pref]

    for tn in tn_opts:
        for tm in tm_opts:
            if _vmem_estimate(tn, tm, d, in_bytes, out_bytes, full_out) <= budget:
                return tn, tm
    return fallback


# ----------------------------------------------------------------------------
# Wrapper (equivalent of Prototype_Pool.forward with flag == 1).
# ----------------------------------------------------------------------------
def prototype_pool_forward(x, memory, all=False, *, compute_dtype=None,
                           force_tiled=False, max_tn=None, max_tm=None):
    """Cosine-similarity logits of x against the prototype pool.

    compute_dtype=jnp.bfloat16 casts the operands before the kernel (halves the
    HBM stream, MXU native bf16 rate); accumulation stays f32 and the output
    keeps x's original dtype, so results differ slightly from the f32 reference.
    """
    N, D = x.shape
    M, Dm = memory.shape
    assert D == Dm
    out_dtype = x.dtype

    if compute_dtype is not None:
        x = x.astype(compute_dtype)
        memory = memory.astype(compute_dtype)
    in_bytes = x.dtype.itemsize
    out_bytes = out_dtype.itemsize

    vmem, cores = _tpu_params()
    tile_budget = min(vmem // 2, 64 * 1024 * 1024)
    vmem_limit = min((vmem * 3) // 4, 96 * 1024 * 1024)

    total_bytes = (in_bytes * (N * D + M * D) + 4 * N * M
                   + out_bytes * N * (M if all else 1))
    if not force_tiled and total_bytes <= _SMALL_PROBLEM_BYTES:
        # Whole problem fits comfortably in VMEM: single invocation, no grid.
        if all:
            return pl.pallas_call(
                _small_all_kernel,
                out_shape=jax.ShapeDtypeStruct((N, M), out_dtype),
            )(x, memory)
        return pl.pallas_call(
            _small_max_kernel,
            out_shape=jax.ShapeDtypeStruct((N, 1), out_dtype),
        )(x, memory)

    tn, tm = _pick_tiles(N, M, D, in_bytes, out_bytes, full_out=all,
                         budget=tile_budget, dual_tc=(cores >= 2),
                         max_tn=max_tn, max_tm=max_tm)
    grid = (N // tn, M // tm)

    # Pool tile streams on the inner j axis; triple-buffer it only when it
    # actually streams, so the short D-deep matmul never waits on DMA issue.
    mem_spec_kwargs = {}
    if grid[1] > 1:
        mem_spec_kwargs["pipeline_mode"] = pl.Buffered(3)
    mem_spec = pl.BlockSpec((tm, D), lambda i, j: (j, 0), **mem_spec_kwargs)
    x_spec = pl.BlockSpec((tn, D), lambda i, j: (i, 0))

    if all:
        return pl.pallas_call(
            _tiled_all_kernel,
            out_shape=jax.ShapeDtypeStruct((N, M), out_dtype),
            grid_spec=pltpu.PrefetchScalarGridSpec(
                num_scalar_prefetch=0,
                grid=grid,
                in_specs=[x_spec, mem_spec],
                out_specs=pl.BlockSpec((tn, tm), lambda i, j: (i, j)),
            ),
            compiler_params=pltpu.CompilerParams(
                dimension_semantics=("parallel", "parallel"),
                vmem_limit_bytes=vmem_limit,
            ),
        )(x, memory)

    # max-only path: no (N, M) writeback at all; lane-dense (1, N) output.
    out_row = pl.pallas_call(
        _tiled_max_kernel,
        out_shape=jax.ShapeDtypeStruct((1, N), out_dtype),
        grid_spec=pltpu.PrefetchScalarGridSpec(
            num_scalar_prefetch=0,
            grid=grid,
            in_specs=[x_spec, mem_spec],
            out_specs=pl.BlockSpec((1, tn), lambda i, j: (0, i)),  # resident over j
            scratch_shapes=[pltpu.VMEM((1, tn), jnp.float32)],
        ),
        compiler_params=pltpu.CompilerParams(
            dimension_semantics=("parallel", "arbitrary"),
            vmem_limit_bytes=vmem_limit,
        ),
    )(x, memory)
    return out_row.reshape(N, 1)


if __name__ == "__main__":
    key = jax.random.PRNGKey(0)
    kx, km = jax.random.split(key)

    # N features of dim D; M strong-OOD prototypes in the pool.
    N, D, M = 16, 32, 256
    x = jax.random.normal(kx, (N, D), dtype=jnp.float32)
    memory = jax.random.normal(km, (M, D), dtype=jnp.float32)
    # update_pool applies F.normalize (L2, dim=1) to the pool buffer.
    memory = memory / jnp.maximum(
        jnp.linalg.norm(memory, axis=1, keepdims=True), 1e-12)

    out_max = prototype_pool_forward(x, memory, all=False)
    out_all = prototype_pool_forward(x, memory, all=True)
    jax.block_until_ready((out_max, out_all))

    ref_all = x @ memory.T
    ref_max = ref_all.max(axis=1, keepdims=True)
    assert out_all.shape == (N, M) and out_max.shape == (N, 1)
    assert jnp.allclose(out_all, ref_all, atol=1e-5)
    assert jnp.allclose(out_max, ref_max, atol=1e-5)

    # Tiled (grid) path, forced at a small size; max_tm=128 makes the pool
    # stream over 4 j-steps so the running-max accumulator and the Buffered(3)
    # pool spec are exercised.
    N2, D2, M2 = 256, 64, 512
    kx2, km2 = jax.random.split(km)
    x2 = jax.random.normal(kx2, (N2, D2), dtype=jnp.float32)
    mem2 = jax.random.normal(km2, (M2, D2), dtype=jnp.float32)
    mem2 = mem2 / jnp.maximum(
        jnp.linalg.norm(mem2, axis=1, keepdims=True), 1e-12)

    t_max = prototype_pool_forward(x2, mem2, all=False,
                                   force_tiled=True, max_tm=128)
    t_all = prototype_pool_forward(x2, mem2, all=True,
                                   force_tiled=True, max_tm=128)
    jax.block_until_ready((t_max, t_all))

    r_all = x2 @ mem2.T
    r_max = r_all.max(axis=1, keepdims=True)
    assert t_all.shape == (N2, M2) and t_max.shape == (N2, 1)
    assert jnp.allclose(t_all, r_all, atol=1e-4)
    assert jnp.allclose(t_max, r_max, atol=1e-4)

    # bf16 HBM-stream / MXU path (approximate numerics by design).
    b_max = prototype_pool_forward(x2, mem2, all=False,
                                   compute_dtype=jnp.bfloat16,
                                   force_tiled=True, max_tm=128)
    b_all = prototype_pool_forward(x2, mem2, all=True,
                                   compute_dtype=jnp.bfloat16,
                                   force_tiled=True, max_tm=128)
    jax.block_until_ready((b_max, b_all))
    assert jnp.allclose(b_all, r_all, atol=0.1)
    assert jnp.allclose(b_max, r_max, atol=0.1)

    print("KERNEL_OK")
</pallas_src>

<mosaic_0001>
module attributes {stable_mosaic.version = 11 : i64} {
  func.func @_small_max_kernel(%arg0: memref<16x32xf32, #tpu.memory_space<vmem>>, %arg1: memref<256x32xf32, #tpu.memory_space<vmem>>, %arg2: memref<16x1xf32, #tpu.memory_space<vmem>>) attributes {dimension_semantics = [], scalar_prefetch = 0 : i64, scratch_operands = 0 : i64, tpu.core_type = #tpu.core_type<tc>} {
    %c0 = arith.constant 0 : index
    %c0_0 = arith.constant 0 : index
    %0 = vector.load %arg0[%c0, %c0_0] : memref<16x32xf32, #tpu.memory_space<vmem>>, vector<16x32xf32>
    %c0_1 = arith.constant 0 : index
    %c0_2 = arith.constant 0 : index
    %1 = vector.load %arg1[%c0_1, %c0_2] : memref<256x32xf32, #tpu.memory_space<vmem>>, vector<256x32xf32>
    %cst = arith.constant dense<0.000000e+00> : vector<16x256xf32>
    %2 = tpu.matmul %0, %1, %cst {dimension_numbers = #tpu.dot_dimension_numbers<[1], [1], [0], [0], [0, 0, 1, 0], [], []>} : vector<16x32xf32>, vector<256x32xf32>, vector<16x256xf32> -> vector<16x256xf32>
    %cst_3 = arith.constant dense<0xFF800000> : vector<16xf32>
    %3 = vector.multi_reduction <maximumf>, %2, %cst_3 [1] : vector<16x256xf32> to vector<16xf32>
    %4 = vector.shape_cast %3 : vector<16xf32> to vector<16x1xf32>
    %c0_4 = arith.constant 0 : index
    %c0_5 = arith.constant 0 : index
    %5 = vector.load %arg2[%c0_4, %c0_5] : memref<16x1xf32, #tpu.memory_space<vmem>>, vector<16x1xf32>
    tpu.vector_store %arg2[%c0_4, %c0_5], %4 {strides = array<i32>} : memref<16x1xf32, #tpu.memory_space<vmem>>, vector<16x1xf32>,
    return
  }
}

</mosaic_0001>

<bundles_post_ra>
// kernel: tpu_custom_call.1
= control target key start
LH: loop header
LB: loop body
LE: loop exit
PB: predicated region body
PF: predicated region fallthrough
CT: control target
= control target key end

     0   :  { %vm45_vm0 = vcmask 261120   ;;  %vm200_vm1 = vcmask 7168   ;;  %s466_s1 = inlined_call_operand.vmem [shape: f32[256,32], index: 1, kind: input, shape index: {}]   ;;  %s467_s0 = inlined_call_operand.vmem [shape: f32[16,32], index: 0, kind: input, shape index: {}]   ;;  %s468_s2 = inlined_call_operand.vmem [shape: f32[16,1], index: 2, kind: output, shape index: {}]  }
   0x1   :  { %v28_v0 = vld [vmem:[%s466_s1 + $0x78] sm:$0xff]  ;;  %v27_v2 = vld [vmem:[%s466_s1 + $0x70] sm:$0xff]  ;;  %v26_v4 = vld [vmem:[%s466_s1 + $0x68] sm:$0xff] }
   0x2   :  { %v44_v1 = vld [vmem:[%s466_s1 + $0xf8] sm:$0xff]  ;;  %207 = vmatpush.xpose.msk.msra.mxu0 %vm45_vm0, %v28_v0  ;;  %243 = vmatpush.xpose.msk.msra.mxu2 %vm45_vm0, %v28_v0  ;;  %v43_v3 = vld [vmem:[%s466_s1 + $0xf0] sm:$0xff]  ;;  %v42_v5 = vld [vmem:[%s466_s1 + $0xe8] sm:$0xff] }
   0x3   :  { %225 = vmatpush.xpose.msk.msra.mxu1 %vm45_vm0, %v44_v1  ;;  %259 = vmatpush.xpose.msk.msra.mxu3 %vm45_vm0, %v44_v1  ;;  %v25_v6 = vld [vmem:[%s466_s1 + $0x60] sm:$0xff]  ;;  %v24_v8 = vld [vmem:[%s466_s1 + $0x58] sm:$0xff]  ;;  %v23_v10 = vld [vmem:[%s466_s1 + $0x50] sm:$0xff] }
   0x4   :  { %v41_v7 = vld [vmem:[%s466_s1 + $0xe0] sm:$0xff]  ;;  %v40_v9 = vld [vmem:[%s466_s1 + $0xd8] sm:$0xff]  ;;  %v39_v11 = vld [vmem:[%s466_s1 + $0xd0] sm:$0xff] }
   0x5   :  { %v22_v12 = vld [vmem:[%s466_s1 + $0x48] sm:$0xff]  ;;  %v21_v14 = vld [vmem:[%s466_s1 + $0x40] sm:$0xff]  ;;  %v20_v16 = vld [vmem:[%s466_s1 + $0x38] sm:$0xff] }
   0x6   :  { %208 = vmatpush.xpose.msk.msra.mxu0 %vm45_vm0, %v27_v2  ;;  %244 = vmatpush.xpose.msk.msra.mxu2 %vm45_vm0, %v27_v2  ;;  %v38_v13 = vld [vmem:[%s466_s1 + $0xc8] sm:$0xff]  ;;  %v37_v15 = vld [vmem:[%s466_s1 + $0xc0] sm:$0xff]  ;;  %v36_v17 = vld [vmem:[%s466_s1 + $0xb8] sm:$0xff] }
   0x7   :  { %226 = vmatpush.xpose.msk.msra.mxu1 %vm45_vm0, %v43_v3  ;;  %260 = vmatpush.xpose.msk.msra.mxu3 %vm45_vm0, %v43_v3  ;;  %v19_v18 = vld [vmem:[%s466_s1 + $0x30] sm:$0xff]  ;;  %v18_v20 = vld [vmem:[%s466_s1 + $0x28] sm:$0xff]  ;;  %v17_v22 = vld [vmem:[%s466_s1 + $0x20] sm:$0xff] }
   0x8   :  { %v35_v19 = vld [vmem:[%s466_s1 + $0xb0] sm:$0xff]  ;;  %v34_v21 = vld [vmem:[%s466_s1 + $0xa8] sm:$0xff]  ;;  %v33_v23 = vld [vmem:[%s466_s1 + $0xa0] sm:$0xff] }
   0x9   :  { %v16_v24 = vld [vmem:[%s466_s1 + $0x18] sm:$0xff]  ;;  %v15_v26 = vld [vmem:[%s466_s1 + $0x10] sm:$0xff]  ;;  %v14_v28 = vld [vmem:[%s466_s1 + $0x8] sm:$0xff] }
   0xa   :  { %209 = vmatpush.xpose.msk.msra.mxu0 %vm45_vm0, %v26_v4  ;;  %245 = vmatpush.xpose.msk.msra.mxu2 %vm45_vm0, %v26_v4  ;;  %v32_v25 = vld [vmem:[%s466_s1 + $0x98] sm:$0xff]  ;;  %v31_v27 = vld [vmem:[%s466_s1 + $0x90] sm:$0xff]  ;;  %v30_v29 = vld [vmem:[%s466_s1 + $0x88] sm:$0xff] }
   0xb   :  { %227 = vmatpush.xpose.msk.msra.mxu1 %vm45_vm0, %v42_v5  ;;  %261 = vmatpush.xpose.msk.msra.mxu3 %vm45_vm0, %v42_v5  ;;  %v13_v30 = vld [vmem:[%s466_s1] sm:$0xff]  ;;  %v12_v33 = vld [vmem:[%s467_s0 + $0x8] sm:$0xff] }
   0xc   :  { %v29_v31 = vld [vmem:[%s466_s1 + $0x80] sm:$0xff] }
   0xd   :  { %v11_v32 = vld [vmem:[%s467_s0] sm:$0xff] }
   0xe   :  { %210 = vmatpush.xpose.msk.msra.mxu0 %vm45_vm0, %v25_v6  ;;  %246 = vmatpush.xpose.msk.msra.mxu2 %vm45_vm0, %v25_v6 }
   0xf   :  { %228 = vmatpush.xpose.msk.msra.mxu1 %vm45_vm0, %v41_v7  ;;  %262 = vmatpush.xpose.msk.msra.mxu3 %vm45_vm0, %v41_v7 }
  0x12   :  { %211 = vmatpush.xpose.msk.msra.mxu0 %vm45_vm0, %v24_v8  ;;  %247 = vmatpush.xpose.msk.msra.mxu2 %vm45_vm0, %v24_v8 }
  0x13   :  { %229 = vmatpush.xpose.msk.msra.mxu1 %vm45_vm0, %v40_v9  ;;  %263 = vmatpush.xpose.msk.msra.mxu3 %vm45_vm0, %v40_v9 }
  0x16   :  { %212 = vmatpush.xpose.msk.msra.mxu0 %vm45_vm0, %v23_v10  ;;  %248 = vmatpush.xpose.msk.msra.mxu2 %vm45_vm0, %v23_v10 }
  0x17   :  { %230 = vmatpush.xpose.msk.msra.mxu1 %vm45_vm0, %v39_v11  ;;  %264 = vmatpush.xpose.msk.msra.mxu3 %vm45_vm0, %v39_v11 }
  0x1a   :  { %213 = vmatpush.xpose.msk.msra.mxu0 %vm45_vm0, %v22_v12  ;;  %249 = vmatpush.xpose.msk.msra.mxu2 %vm45_vm0, %v22_v12 }
  0x1b   :  { %231 = vmatpush.xpose.msk.msra.mxu1 %vm45_vm0, %v38_v13  ;;  %265 = vmatpush.xpose.msk.msra.mxu3 %vm45_vm0, %v38_v13 }
  0x1e   :  { %214 = vmatpush.xpose.msk.msra.mxu0 %vm45_vm0, %v21_v14  ;;  %250 = vmatpush.xpose.msk.msra.mxu2 %vm45_vm0, %v21_v14 }
  0x1f   :  { %232 = vmatpush.xpose.msk.msra.mxu1 %vm45_vm0, %v37_v15  ;;  %266 = vmatpush.xpose.msk.msra.mxu3 %vm45_vm0, %v37_v15 }
  0x22   :  { %215 = vmatpush.xpose.msk.msra.mxu0 %vm45_vm0, %v20_v16  ;;  %251 = vmatpush.xpose.msk.msra.mxu2 %vm45_vm0, %v20_v16 }
  0x23   :  { %233 = vmatpush.xpose.msk.msra.mxu1 %vm45_vm0, %v36_v17  ;;  %267 = vmatpush.xpose.msk.msra.mxu3 %vm45_vm0, %v36_v17 }
  0x26   :  { %216 = vmatpush.xpose.msk.msra.mxu0 %vm45_vm0, %v19_v18  ;;  %252 = vmatpush.xpose.msk.msra.mxu2 %vm45_vm0, %v19_v18 }
  0x27   :  { %234 = vmatpush.xpose.msk.msra.mxu1 %vm45_vm0, %v35_v19  ;;  %268 = vmatpush.xpose.msk.msra.mxu3 %vm45_vm0, %v35_v19 }
  0x2a   :  { %217 = vmatpush.xpose.msk.msra.mxu0 %vm45_vm0, %v18_v20  ;;  %253 = vmatpush.xpose.msk.msra.mxu2 %vm45_vm0, %v18_v20 }
  0x2b   :  { %235 = vmatpush.xpose.msk.msra.mxu1 %vm45_vm0, %v34_v21  ;;  %269 = vmatpush.xpose.msk.msra.mxu3 %vm45_vm0, %v34_v21 }
  0x2e   :  { %218 = vmatpush.xpose.msk.msra.mxu0 %vm45_vm0, %v17_v22  ;;  %254 = vmatpush.xpose.msk.msra.mxu2 %vm45_vm0, %v17_v22 }
  0x2f   :  { %236 = vmatpush.xpose.msk.msra.mxu1 %vm45_vm0, %v33_v23  ;;  %270 = vmatpush.xpose.msk.msra.mxu3 %vm45_vm0, %v33_v23 }
  0x32   :  { %219 = vmatpush.xpose.msk.msra.mxu0 %vm45_vm0, %v16_v24  ;;  %255 = vmatpush.xpose.msk.msra.mxu2 %vm45_vm0, %v16_v24 }
  0x33   :  { %237 = vmatpush.xpose.msk.msra.mxu1 %vm45_vm0, %v32_v25  ;;  %271 = vmatpush.xpose.msk.msra.mxu3 %vm45_vm0, %v32_v25 }
  0x36   :  { %220 = vmatpush.xpose.msk.msra.mxu0 %vm45_vm0, %v15_v26  ;;  %256 = vmatpush.xpose.msk.msra.mxu2 %vm45_vm0, %v15_v26 }
  0x37   :  { %238 = vmatpush.xpose.msk.msra.mxu1 %vm45_vm0, %v31_v27  ;;  %272 = vmatpush.xpose.msk.msra.mxu3 %vm45_vm0, %v31_v27 }
  0x3a   :  { %221 = vmatpush.xpose.msk.msra.mxu0 %vm45_vm0, %v14_v28  ;;  %257 = vmatpush.xpose.msk.msra.mxu2 %vm45_vm0, %v14_v28 }
  0x3b   :  { %239 = vmatpush.xpose.msk.msra.mxu1 %vm45_vm0, %v30_v29  ;;  %273 = vmatpush.xpose.msk.msra.mxu3 %vm45_vm0, %v30_v29 }
  0x3e   :  { %222 = vmatpush.xpose.msk.msra.mxu0 %vm45_vm0, %v13_v30  ;;  %258 = vmatpush.xpose.msk.msra.mxu2 %vm45_vm0, %v13_v30 }
  0x3f   :  { %240 = vmatpush.xpose.msk.msra.mxu1 %vm45_vm0, %v29_v31  ;;  %274 = vmatpush.xpose.msk.msra.mxu3 %vm45_vm0, %v29_v31 }
  0x41   :  { %223 = vmatmul.msk.f32.vlgmr.msra.gmra.mxu0 %vm45_vm0, %v11_v32  ;;  %224 = vmatmul.msk.f32.vlgmr.msra.gmra.mxu2 %vm45_vm0, %v12_v33 }
  0x42   :  { %241 = vmatmul.msk.f32.vlgmr.msra.gmra.mxu1 %vm45_vm0, %v11_v32  ;;  %242 = vmatmul.msk.f32.vlgmr.msra.gmra.mxu3 %vm45_vm0, %v12_v33 }
  0xbe   :  { %v165_v34 = vpop.f32.mrf.mxu0 }
  0xbf   :  { %v188_v35 = vpop.f32.mrf.mxu1 }
  0xc0   :  { %v194_v36 = vmax.f32 %v165_v34, %v188_v35 }
  0xc2   :  { %195 = vmax.xlane.f32.xlu0 %v194_v36 }
  0xc4   :  { %v168_v37 = vpop.f32.mrf.mxu2 }
  0xc5   :  { %v191_v38 = vpop.f32.mrf.mxu3 }
  0xc6   :  { %v197_v39 = vmax.f32 %v168_v37, %v191_v38 }
  0xca   :  { %198 = vmax.xlane.f32.xlu0 %v197_v39 }
 0x135   :  { %v196_v40 = vpop.xlane.xlu0 %195 }
 0x136   :  { %201 = vst.msk [vmem:[%s468_s2] sm:$0xff] %vm200_vm1, %v196_v40 }
 0x13d   :  { %v199_v41 = vpop.xlane.xlu0 %198 }
 0x13e   :  { %202 = vst.msk [vmem:[%s468_s2 + $0x8] sm:$0xff] %vm200_vm1, %v199_v41 }

</bundles_post_ra>
